<compile_context>
chip_gen: v5e
topology: v5e:2x2
jax: 0.10.0
libtpu: 0.0.40
codegen_flags: <defaults>
</compile_context>

<pallas_src>
import jax
import jax.numpy as jnp
from jax.experimental import pallas as pl
from jax.experimental.pallas import tpu as pltpu


# ----------------------------- kernels ------------------------------------ #

def _droppath_kernel(mask_ref, x_ref, o_ref):
    # mask_ref: (1, bd_block), already scaled by 1/keep_prob, in x.dtype.
    # x_ref / o_ref: (t_block, bd_block).  Pure streaming multiply (VPU).
    o_ref[...] = x_ref[...] * mask_ref[...]


def _droppath_residual_kernel(mask_ref, x_ref, res_ref, o_ref):
    # Fused residual add: o = residual + x * mask (all native dtype).
    o_ref[...] = res_ref[...] + x_ref[...] * mask_ref[...]


# --------------------------- tiling helpers -------------------------------- #

def _per_gen_tile_target(n_streams: int) -> int:
    """Per-tile byte target so 2 buffers x n_streams tiles fit the default
    scoped-VMEM limit of the current chip generation (no vmem_limit_bytes)."""
    kind = ""
    try:
        kind = jax.devices()[0].device_kind.lower()
    except Exception:
        pass
    if "v7" in kind:
        base = 6 * 1024 * 1024   # 3.2 TB/s HBM: bigger tiles amortize per-step cost
    elif "v6" in kind:
        base = 4 * 1024 * 1024   # near the roofline knee; 32 MiB scoped default
    else:
        base = 2 * 1024 * 1024   # v5e / unknown: 16 MiB scoped default, stay safe
    # base is calibrated for 2 streamed arrays (x in + out); rescale for fusion.
    return max(512 * 1024, (base * 2) // max(n_streams, 1))


def _choose_bd_block(BD: int, itemsize: int, sub: int, target_bytes: int) -> int:
    """Full row if a minimum-height tile fits the budget, else tile lanes in
    multiples of 128 (keeps stores lane-dense and blocks VMEM-safe for wide
    models where sub * B*D * itemsize alone would exceed scoped VMEM)."""
    if BD <= 128 or sub * BD * itemsize <= target_bytes:
        return BD
    bd = (target_bytes // (sub * itemsize)) // 128 * 128
    bd = max(128, bd)
    return min(bd, BD)


def _choose_t_block(T: int, row_elems: int, itemsize: int, target_bytes: int) -> int:
    """Sequence tile: sublane-aligned (8 rows f32 / 16 bf16 / 32 int8), sized
    to ~target_bytes, with the step count nudged even for a balanced megacore
    split.  No minimum-step clamp (per-step overhead dominates on v7x)."""
    sub = max(8, 32 // max(itemsize, 1))
    if T <= sub:
        return T                                   # full dim is always legal
    row_bytes = max(row_elems * itemsize, 1)
    tb = (target_bytes // row_bytes) // sub * sub
    tb = max(tb, sub)
    if tb >= T:
        return T
    tb = min(tb, (T // sub) * sub)                 # stay sublane-aligned, < T
    # Prefer an even number of grid steps so both v7x TensorCores get equal work.
    steps = (T + tb - 1) // tb
    if steps > 1 and steps % 2 == 1:
        cand = -(-T // (steps + 1))                # ceil(T / (steps+1))
        cand = -(-cand // sub) * sub               # round up to sublane multiple
        cand = max(sub, min(cand, tb))
        if ((T + cand - 1) // cand) % 2 == 0:
            tb = cand
    return tb


# ------------------------------ wrapper ------------------------------------ #

def drop_path(x, key, drop_prob: float = 0.0, training: bool = False,
              scale_by_keep: bool = True, residual=None,
              t_block: int | None = None, bd_block: int | None = None):
    """JAX/Pallas equivalent of the torch drop_path function.

    If `residual` is given, returns `residual + drop_path(x)` fused in a
    single HBM pass (the usual residual-block usage).
    """
    if drop_prob == 0.0 or not training:
        return x if residual is None else residual + x
    keep_prob = 1.0 - drop_prob
    T, B, D = x.shape
    BD = B * D

    # Per-sample Bernoulli mask over axis 1 (torch mask shape (1, B, 1)).
    # RNG + scaling stays in plain JAX; the hot T*B*D multiply runs in-kernel.
    mask_b = jax.random.bernoulli(key, keep_prob, (B,)).astype(jnp.float32)
    if keep_prob > 0.0 and scale_by_keep:
        mask_b = mask_b / keep_prob
    # Lane-dense (1, B*D) row in x's dtype: element (b*D + d) = mask_b[b].
    mask = jnp.repeat(mask_b, D).reshape(1, BD).astype(x.dtype)

    x2 = x.reshape(T, BD)

    fused = residual is not None
    n_streams = 3 if fused else 2
    itemsize = jnp.dtype(x.dtype).itemsize
    sub = max(8, 32 // max(itemsize, 1))
    target_bytes = _per_gen_tile_target(n_streams)
    if bd_block is None:
        bd_block = _choose_bd_block(BD, itemsize, sub, target_bytes)
    if t_block is None:
        t_block = _choose_t_block(T, bd_block, itemsize, target_bytes)

    grid = (pl.cdiv(T, t_block), pl.cdiv(BD, bd_block))
    mask_spec = pl.BlockSpec((1, bd_block), lambda i, j: (0, j))   # tiny, lane-tiled
    x_spec = pl.BlockSpec((t_block, bd_block), lambda i, j: (i, j))
    out_spec = pl.BlockSpec((t_block, bd_block), lambda i, j: (i, j))

    if fused:
        kernel = _droppath_residual_kernel
        inputs = (mask, x2, residual.reshape(T, BD))
        in_specs = [mask_spec, x_spec, x_spec]
    else:
        kernel = _droppath_kernel
        inputs = (mask, x2)
        in_specs = [mask_spec, x_spec]

    out2 = pl.pallas_call(
        kernel,
        out_shape=jax.ShapeDtypeStruct((T, BD), x.dtype),
        grid_spec=pl.GridSpec(
            grid=grid,
            in_specs=in_specs,
            out_specs=out_spec,
        ),
        compiler_params=pltpu.CompilerParams(
            dimension_semantics=("parallel", "parallel")),
        # x2 may be written in place when the caller donates x (free; halves
        # peak HBM footprint, lets XLA elide a copy).
        input_output_aliases={1: 0},
    )(*inputs)
    return out2.reshape(T, B, D)


class DropPath:
    """Drop paths (Stochastic Depth) per sample along axis 1 of (T, B, D)."""

    def __init__(self, drop_prob: float = 0.0, scale_by_keep: bool = True):
        self.drop_prob = drop_prob
        self.scale_by_keep = scale_by_keep
        self.training = True  # mirror torch nn.Module default .train() semantics

    def __call__(self, x, key, residual=None):
        return drop_path(x, key, self.drop_prob, self.training,
                         self.scale_by_keep, residual=residual)


# ------------------------------- self-test --------------------------------- #

if __name__ == "__main__":
    root = jax.random.PRNGKey(0)
    k_x, k_mask, k_res = jax.random.split(root, 3)

    # Case 1: lane-aligned shapes (B*D = 128, T multiple of 8).
    T, B, D = 8, 4, 32
    drop_prob = 0.25
    keep_prob = 1.0 - drop_prob
    x = jax.random.normal(k_x, (T, B, D), dtype=jnp.float32)
    module = DropPath(drop_prob=drop_prob, scale_by_keep=True)
    out = jax.block_until_ready(module(x, k_mask))
    ref_mask = jax.random.bernoulli(k_mask, keep_prob, (B,)).astype(jnp.float32) / keep_prob
    ref = x * ref_mask.reshape(1, B, 1)
    assert out.shape == x.shape and out.dtype == x.dtype
    assert jnp.allclose(out, ref, atol=1e-6, rtol=1e-6)

    # Case 2: ragged shapes (B*D % 128 != 0, T % t_block != 0) exercise the
    # partial-block masked-store paths.
    T2, B2, D2 = 13, 3, 20
    x2 = jax.random.normal(k_x, (T2, B2, D2), dtype=jnp.float32)
    out2 = jax.block_until_ready(drop_path(x2, k_mask, 0.5, training=True))
    m2 = jax.random.bernoulli(k_mask, 0.5, (B2,)).astype(jnp.float32) / 0.5
    ref2 = x2 * m2.reshape(1, B2, 1)
    assert jnp.allclose(out2, ref2, atol=1e-6, rtol=1e-6)

    # Case 3: bf16 + fused residual add (o = residual + x * mask).
    T3, B3, D3 = 33, 5, 48
    x3 = jax.random.normal(k_x, (T3, B3, D3), dtype=jnp.bfloat16)
    r3 = jax.random.normal(k_res, (T3, B3, D3), dtype=jnp.bfloat16)
    out3 = jax.block_until_ready(drop_path(x3, k_mask, 0.3, training=True, residual=r3))
    m3 = (jax.random.bernoulli(k_mask, 0.7, (B3,)).astype(jnp.float32) / 0.7
          ).astype(jnp.bfloat16)
    ref3 = r3 + x3 * m3.reshape(1, B3, 1)
    assert out3.dtype == jnp.bfloat16
    assert jnp.allclose(out3.astype(jnp.float32), ref3.astype(jnp.float32),
                        atol=1e-2, rtol=1e-2)

    # Case 4: eval / drop_prob == 0 path is identity.
    module_eval = DropPath(drop_prob=drop_prob)
    module_eval.training = False
    out_eval = jax.block_until_ready(module_eval(x, k_mask))
    assert jnp.array_equal(out_eval, x)

    print("KERNEL_OK")
</pallas_src>

<mosaic_0001>
module attributes {stable_mosaic.version = 11 : i64} {
  func.func @_droppath_kernel(%arg0: i32, %arg1: i32, %arg2: memref<1x128xf32, #tpu.memory_space<vmem>>, %arg3: memref<8x128xf32, #tpu.memory_space<vmem>>, %arg4: memref<8x128xf32, #tpu.memory_space<vmem>>) attributes {dimension_semantics = [#tpu.dimension_semantics<parallel>, #tpu.dimension_semantics<parallel>], iteration_bounds = array<i64: 1, 1>, scalar_prefetch = 0 : i64, scratch_operands = 0 : i64, tpu.core_type = #tpu.core_type<tc>, window_params = [{transform_indices = @transform_0, window_bounds = array<i64: 1, 128>}, {transform_indices = @transform_1, window_bounds = array<i64: 8, 128>}, {transform_indices = @transform_2, window_bounds = array<i64: 8, 128>}]} {
    %c0 = arith.constant 0 : index
    %c0_0 = arith.constant 0 : index
    %0 = vector.load %arg3[%c0, %c0_0] : memref<8x128xf32, #tpu.memory_space<vmem>>, vector<8x128xf32>
    %c0_1 = arith.constant 0 : index
    %c0_2 = arith.constant 0 : index
    %1 = vector.load %arg2[%c0_1, %c0_2] : memref<1x128xf32, #tpu.memory_space<vmem>>, vector<1x128xf32>
    %2 = vector.broadcast %1 : vector<1x128xf32> to vector<8x128xf32>
    %3 = arith.mulf %0, %2 : vector<8x128xf32>
    %c0_3 = arith.constant 0 : index
    %c0_4 = arith.constant 0 : index
    %4 = vector.load %arg4[%c0_3, %c0_4] : memref<8x128xf32, #tpu.memory_space<vmem>>, vector<8x128xf32>
    tpu.vector_store %arg4[%c0_3, %c0_4], %3 {strides = array<i32>} : memref<8x128xf32, #tpu.memory_space<vmem>>, vector<8x128xf32>,
    return
  }
  func.func @transform_0(%arg0: i32, %arg1: i32) -> (i32, i32) {
    %c0_i32 = arith.constant 0 : i32
    %c0_i32_0 = arith.constant 0 : i32
    return %c0_i32, %arg1 : i32, i32
  }
  func.func @transform_1(%arg0: i32, %arg1: i32) -> (i32, i32) {
    %c0_i32 = arith.constant 0 : i32
    return %arg0, %arg1 : i32, i32
  }
  func.func @transform_2(%arg0: i32, %arg1: i32) -> (i32, i32) {
    %c0_i32 = arith.constant 0 : i32
    return %arg0, %arg1 : i32, i32
  }
}

</mosaic_0001>

<bundles_post_ra>
// kernel: tpu_custom_call.1
= control target key start
LH: loop header
LB: loop body
LE: loop exit
PB: predicated region body
PF: predicated region fallthrough
CT: control target
= control target key end

     0   :  { %7 = vsyncpa [#allocation3], 0  ;;  %s131_s0 = inlined_call_operand.vmem [shape: f32[1,128], index: 0, kind: input, shape index: {}]   ;;  %s132_s1 = inlined_call_operand.hbm [shape: f32[8,128], index: 1, kind: input, shape index: {}, may-alias: {1,2}]   ;;  %s133_s2 = inlined_call_operand.hbm [shape: f32[8,128], index: 2, kind: output, shape index: {}, may-alias: {1,2}]  }
   0x1   :  { %8 = vsyncpa [#allocation4], 0  ;;  %s16_s11 = sshll.u32 %s132_s1, 4  ;;  %s105_s12 = smov [#allocation2]   ;;  %s17_s11 = int_to_ptr.hbm [resolvable:$true] %s16_s11 }
   0x2   :  { %s18_s13 = sshll.u32 %s105_s12, 4  ;;  %s19_s13 = int_to_ptr.vmem [resolvable:$true] %s18_s13 }
   0x3   :  { %21 = dma.hbm_to_vmem [thread:$0]  %s17_s11, 128, %s19_s13, [#allocation3]  }
   0x4   :  { %101 = dma.done.wait [#allocation3], 128  }
   0x5   :  { %102 = vsyncadd [#allocation3], 4294967168  ;;  %s106_s14 = smov [#allocation5]   ;;  %s40_s18 = sshll.u32 %s133_s2, 4  ;;  %v26_v0 = vld [vmem:[#allocation2] sm:$0xff]  ;;  %s41_s18 = int_to_ptr.hbm [resolvable:$true] %s40_s18 }
   0x6   :  { %s38_s15 = sshll.u32 %s106_s14, 4  ;;  %v52_v1 = vld [vmem:[%s131_s0] ss:$0 sm:$0xff]  ;;  %s39_s15 = int_to_ptr.vmem [resolvable:$true] %s38_s15 }
   0x7   :  { %v31_v2 = vmul.f32 %v52_v1, %v26_v0 }
   0x9   :  { %32 = vst [vmem:[#allocation5] sm:$0xff] %v31_v2 }
   0xa   :  { %43 = dma.vmem_to_hbm [thread:$0]  %s39_s15, 128, %s41_s18, [#allocation4]  }
   0xb   :  { %103 = dma.done.wait [#allocation4], 128  }
   0xc   :  { %104 = vsyncadd [#allocation4], 4294967168 }
   0xd   :  { %48 = vsyncpa [#allocation3], 1 }
   0xe   :  { %49 = vsyncpa [#allocation4], 1 }

</bundles_post_ra>
